<compile_context>
chip_gen: v6e
topology: v6e:2x2x1
jax: 0.10.0
libtpu: 0.0.40
codegen_flags: <defaults>
</compile_context>

<pallas_src>
import jax
import jax.numpy as jnp
from jax.experimental import pallas as pl
from jax.experimental.pallas import tpu as pltpu


def _round_up(n, m):
    return ((n + m - 1) // m) * m


# ---------------------------------------------------------------------------
# Kernels
# ---------------------------------------------------------------------------
def _linear_kernel_f32out(x_ref, w_ref, b_ref, o_ref):
    """x (tm,tk) @ W_t (tk,tn) + b, accumulating directly into the f32 output
    block (output-resident accumulator across the k grid axis)."""
    k = pl.program_id(2)

    @pl.when(k == 0)
    def _():
        o_ref[...] = jnp.broadcast_to(b_ref[...], o_ref.shape)

    o_ref[...] += jnp.dot(x_ref[...], w_ref[...],
                          preferred_element_type=jnp.float32)


def _linear_kernel_acc(x_ref, w_ref, b_ref, o_ref, acc_ref):
    """Same contraction, but with an f32 scratch accumulator for non-f32
    output dtypes (cast happens once in the k==last epilogue)."""
    k = pl.program_id(2)

    @pl.when(k == 0)
    def _():
        acc_ref[...] = jnp.broadcast_to(b_ref[...], acc_ref.shape)

    acc_ref[...] += jnp.dot(x_ref[...], w_ref[...],
                            preferred_element_type=jnp.float32)

    @pl.when(k == pl.num_programs(2) - 1)
    def _():
        o_ref[...] = acc_ref[...].astype(o_ref.dtype)


# ---------------------------------------------------------------------------
# Wrapper
# ---------------------------------------------------------------------------
def make_linear_classifier(weight, bias, *, tm=512, tn=512, tk=1024,
                           out_dtype=None, buffer_count=2):
    """Prepare nn.Linear params once (pad + transpose, hoisted out of the
    per-call path) and return forward(x): (B, F) -> (B, C).

    weight: (C, F), bias: (C,).
    """
    C, F = weight.shape
    assert bias.shape == (C,)

    # Class / feature tiles: large & lane-aligned; shrink for small problems.
    tn = min(tn, _round_up(C, 128))
    tk = min(tk, _round_up(F, 128))
    Cp, Fp = _round_up(C, tn), _round_up(F, tk)

    # Pad once, transpose once -> canonical (Fp, Cp) RHS for the MXU.
    w_t = jnp.pad(weight, ((0, Cp - C), (0, Fp - F))).T            # (Fp, Cp)
    b2d = jnp.pad(bias.astype(jnp.float32), (0, Cp - C)).reshape(1, Cp)

    wb = jnp.dtype(w_t.dtype).itemsize
    nbuf = max(2, int(buffer_count))

    def forward(x):
        B, Fx = x.shape
        assert Fx == F, f"expected feature size {F}, got {Fx}"
        odt = jnp.dtype(out_dtype) if out_dtype is not None else x.dtype
        use_f32_out = odt == jnp.float32

        tm_c = min(tm, _round_up(B, 8))
        # Megacore (v7x): avoid a degenerate (1,1,K) grid when B allows 2 tiles.
        if Cp // tn == 1 and _round_up(B, 8) >= 16 and tm_c >= _round_up(B, 8):
            tm_c = _round_up(_round_up(B, 8) // 2, 8)
        Bp = _round_up(B, tm_c)

        xp = x if (Bp, Fp) == (B, F) else jnp.pad(x, ((0, Bp - B), (0, Fp - F)))

        grid = (Bp // tm_c, Cp // tn, Fp // tk)

        if nbuf > 2:
            xspec = pl.BlockSpec((tm_c, tk), lambda i, j, k: (i, k),
                                 pipeline_mode=pl.Buffered(nbuf))
            wspec = pl.BlockSpec((tk, tn), lambda i, j, k: (k, j),
                                 pipeline_mode=pl.Buffered(nbuf))
        else:
            xspec = pl.BlockSpec((tm_c, tk), lambda i, j, k: (i, k))
            wspec = pl.BlockSpec((tk, tn), lambda i, j, k: (k, j))
        bspec = pl.BlockSpec((1, tn), lambda i, j, k: (0, j))

        kernel = _linear_kernel_f32out if use_f32_out else _linear_kernel_acc
        scratch = [] if use_f32_out else [pltpu.VMEM((tm_c, tn), jnp.float32)]

        # VMEM budget derived from the actual tiles and buffer depth.
        xb = jnp.dtype(x.dtype).itemsize
        ob = jnp.dtype(odt).itemsize
        vmem_bytes = (nbuf * (tm_c * tk * xb + tk * tn * wb + tn * 4)
                      + 2 * tm_c * tn * ob
                      + (0 if use_f32_out else tm_c * tn * 4))
        vmem_limit = max(4 << 20, min(int(vmem_bytes * 1.25) + (1 << 20),
                                      60 << 20))

        cost = pl.CostEstimate(
            flops=int(2 * Bp * Cp * Fp),
            transcendentals=0,
            bytes_accessed=int(Bp * Fp * xb * (Cp // tn)
                               + Fp * Cp * wb * (Bp // tm_c)
                               + Bp * Cp * ob + Cp * 4))

        out = pl.pallas_call(
            kernel,
            out_shape=jax.ShapeDtypeStruct((Bp, Cp), odt),
            grid_spec=pltpu.PrefetchScalarGridSpec(
                num_scalar_prefetch=0,
                grid=grid,
                in_specs=[xspec, wspec, bspec],
                out_specs=pl.BlockSpec((tm_c, tn), lambda i, j, k: (i, j)),
                scratch_shapes=scratch,
            ),
            compiler_params=pltpu.CompilerParams(
                dimension_semantics=("parallel", "parallel", "arbitrary"),
                vmem_limit_bytes=vmem_limit,
            ),
            cost_estimate=cost,
        )(xp, w_t, b2d)

        if (Bp, Cp) != (B, C):
            out = out[:B, :C]
        return out

    return forward


def linear_classifier_forward(x, weight, bias, **kwargs):
    """One-off convenience wrapper (param prep + forward in one call)."""
    return make_linear_classifier(weight, bias, **kwargs)(x)


if __name__ == "__main__":
    # Synthetic config (the original reads feature_size from a json config).
    feature_size = 32
    num_classes = 16
    batch = 8

    key = jax.random.PRNGKey(0)
    kx, kw, kb = jax.random.split(key, 3)

    x = jax.random.normal(kx, (batch, feature_size), dtype=jnp.float32)
    # Deterministic init matching nn.Linear's U(-1/sqrt(F), 1/sqrt(F)).
    bound = 1.0 / (feature_size ** 0.5)
    weight = jax.random.uniform(kw, (num_classes, feature_size),
                                minval=-bound, maxval=bound, dtype=jnp.float32)
    bias = jax.random.uniform(kb, (num_classes,),
                              minval=-bound, maxval=bound, dtype=jnp.float32)

    # Params padded/transposed once; per-call path only (maybe) pads x.
    forward = make_linear_classifier(weight, bias)
    out = jax.block_until_ready(forward(x))

    # Cross-check against plain JAX reference.
    ref = x @ weight.T + bias
    assert out.shape == (batch, num_classes)
    assert jnp.allclose(out, ref, atol=1e-5, rtol=1e-5)

    print("KERNEL_OK")
</pallas_src>

<mosaic_0001>
module attributes {stable_mosaic.version = 11 : i64} {
  func.func @_linear_kernel_f32out(%arg0: i32, %arg1: i32, %arg2: i32, %arg3: memref<8x128xf32, #tpu.memory_space<vmem>>, %arg4: memref<128x128xf32, #tpu.memory_space<vmem>>, %arg5: memref<1x128xf32, #tpu.memory_space<vmem>>, %arg6: memref<8x128xf32, #tpu.memory_space<vmem>>) attributes {dimension_semantics = [#tpu.dimension_semantics<parallel>, #tpu.dimension_semantics<parallel>, #tpu.dimension_semantics<arbitrary>], iteration_bounds = array<i64: 1, 1, 1>, scalar_prefetch = 0 : i64, scratch_operands = 0 : i64, tpu.core_type = #tpu.core_type<tc>, window_params = [{transform_indices = @transform_0, window_bounds = array<i64: 8, 128>}, {transform_indices = @transform_1, window_bounds = array<i64: 128, 128>}, {transform_indices = @transform_2, window_bounds = array<i64: 1, 128>}, {transform_indices = @transform_3, window_bounds = array<i64: 8, 128>}]} {
    %c0_i32 = arith.constant 0 : i32
    %0 = arith.cmpi eq, %arg2, %c0_i32 : i32
    %1 = arith.extui %0 : i1 to i32
    %c0_i32_0 = arith.constant 0 : i32
    %2 = arith.cmpi ne, %1, %c0_i32_0 : i32
    scf.if %2 {
      %c0_8 = arith.constant 0 : index
      %c0_9 = arith.constant 0 : index
      %9 = vector.load %arg5[%c0_8, %c0_9] : memref<1x128xf32, #tpu.memory_space<vmem>>, vector<1x128xf32>
      %10 = vector.shape_cast %9 : vector<1x128xf32> to vector<1x128xf32>
      %11 = vector.broadcast %10 : vector<1x128xf32> to vector<8x128xf32>
      %c0_10 = arith.constant 0 : index
      %c0_11 = arith.constant 0 : index
      %12 = vector.load %arg6[%c0_10, %c0_11] : memref<8x128xf32, #tpu.memory_space<vmem>>, vector<8x128xf32>
      tpu.vector_store %arg6[%c0_10, %c0_11], %11 {strides = array<i32>} : memref<8x128xf32, #tpu.memory_space<vmem>>, vector<8x128xf32>,
    } else {
    }
    %c0 = arith.constant 0 : index
    %c0_1 = arith.constant 0 : index
    %3 = vector.load %arg6[%c0, %c0_1] : memref<8x128xf32, #tpu.memory_space<vmem>>, vector<8x128xf32>
    %c0_2 = arith.constant 0 : index
    %c0_3 = arith.constant 0 : index
    %4 = vector.load %arg3[%c0_2, %c0_3] : memref<8x128xf32, #tpu.memory_space<vmem>>, vector<8x128xf32>
    %c0_4 = arith.constant 0 : index
    %c0_5 = arith.constant 0 : index
    %5 = vector.load %arg4[%c0_4, %c0_5] : memref<128x128xf32, #tpu.memory_space<vmem>>, vector<128x128xf32>
    %cst = arith.constant dense<0.000000e+00> : vector<8x128xf32>
    %6 = tpu.matmul %4, %5, %cst {dimension_numbers = #tpu.dot_dimension_numbers<[1], [0], [0], [1], [0, 0, 1, 1], [], []>} : vector<8x128xf32>, vector<128x128xf32>, vector<8x128xf32> -> vector<8x128xf32>
    %7 = arith.addf %3, %6 : vector<8x128xf32>
    %c0_6 = arith.constant 0 : index
    %c0_7 = arith.constant 0 : index
    %8 = vector.load %arg6[%c0_6, %c0_7] : memref<8x128xf32, #tpu.memory_space<vmem>>, vector<8x128xf32>
    tpu.vector_store %arg6[%c0_6, %c0_7], %7 {strides = array<i32>} : memref<8x128xf32, #tpu.memory_space<vmem>>, vector<8x128xf32>,
    return
  }
  func.func @transform_0(%arg0: i32, %arg1: i32, %arg2: i32) -> (i32, i32) {
    %c0_i32 = arith.constant 0 : i32
    return %arg0, %arg2 : i32, i32
  }
  func.func @transform_1(%arg0: i32, %arg1: i32, %arg2: i32) -> (i32, i32) {
    %c0_i32 = arith.constant 0 : i32
    return %arg2, %arg1 : i32, i32
  }
  func.func @transform_2(%arg0: i32, %arg1: i32, %arg2: i32) -> (i32, i32) {
    %c0_i32 = arith.constant 0 : i32
    %c0_i32_0 = arith.constant 0 : i32
    return %c0_i32, %arg1 : i32, i32
  }
  func.func @transform_3(%arg0: i32, %arg1: i32, %arg2: i32) -> (i32, i32) {
    %c0_i32 = arith.constant 0 : i32
    return %arg0, %arg1 : i32, i32
  }
}

</mosaic_0001>

<bundles_post_ra>
// kernel: tpu_custom_call.1
= control target key start
LH: loop header
LB: loop body
LE: loop exit
PB: predicated region body
PF: predicated region fallthrough
CT: control target
= control target key end

     0   :  { %8 = vsyncpa [#allocation3], 0  ;;  %s324_s0 = inlined_call_operand.hbm [shape: f32[8,128], index: 0, kind: input, shape index: {}]   ;;  %s325_s1 = inlined_call_operand.hbm [shape: f32[128,128], index: 1, kind: input, shape index: {}]   ;;  %s326_s2 = inlined_call_operand.vmem [shape: f32[1,128], index: 2, kind: input, shape index: {}]   ;;  %s327_s3 = inlined_call_operand.hbm [shape: f32[8,128], index: 3, kind: output, shape index: {}]  }
   0x1   :  { %9 = vsyncpa [#allocation6], 0 }
   0x2   :  { %10 = vsyncpa [#allocation4], 0  ;;  %s285_s12 = smov [#allocation2]   ;;  %s286_s14 = smov [#allocation5]  }
   0x3   :  { %s17_s13 = sshll.u32 %s285_s12, 4  ;;  %s26_s15 = sshll.u32 %s286_s14, 4  ;;  %s18_s13 = int_to_ptr.vmem [resolvable:$true] %s17_s13  ;;  %s27_s15 = int_to_ptr.vmem [resolvable:$true] %s26_s15 }
   0x4   :  { %s227_s16 = scalar_lea.vmem %s18_s13, 128  ;;  %p232_p1 = scmp.lt.s32.totalorder %s18_s13, %s18_s13 }
   0x5   :  { %p228_p0 = scmp.ne.s32.totalorder %s18_s13, %s227_s16  ;;  %p233_p2 = scmp.lt.s32.totalorder %s227_s16, %s227_s16 }
   0x7   :  { %p234_p3 = por %p233_p2, %p232_p1 }
   0x9   :  { %p235_p4 = pnand %p234_p3, %p228_p0 }
   0xb   :  { %238 = shalt.err (!%p235_p4)
}
   0xc   :  { %20 = dma.hbm_to_vmem [thread:$0]  %s324_s0, 128, %s18_s13, [#allocation3]  }
   0xd   :  { %s247_s19 = scalar_lea.vmem %s27_s15, 2048  ;;  %p252_p6 = scmp.lt.s32.totalorder %s27_s15, %s27_s15 }
   0xe   :  { %p248_p5 = scmp.ne.s32.totalorder %s27_s15, %s247_s19  ;;  %p253_p7 = scmp.lt.s32.totalorder %s247_s19, %s247_s19 }
  0x10   :  { %p254_p8 = por %p253_p7, %p252_p6 }
  0x12   :  { %p255_p9 = pnand %p254_p8, %p248_p5 }
  0x14   :  { %258 = shalt.err (!%p255_p9)
}
  0x15   :  { %s287_s20 = smov 128   ;;  %s288_s21 = smov 8  }
  0x16   :  { %32 = dma.hbm_to_vmem [thread:$0]  %s325_s1, 2048, %s27_s15, [#allocation6], %s287_s20, %s287_s20, %s288_s21  }
  0x17   :  { %279 = dma.done.wait [#allocation3], 128  }
  0x18   :  { %280 = vsyncadd [#allocation3], 4294967168 }
  0x19   :  { %281 = dma.done.wait [#allocation6], 2048  }
  0x1a   :  { %282 = vsyncadd [#allocation6], 4294965248  ;;  %v289_v0 = vmov 0.0   ;;  %vm290_vm0 = vmmov 0   ;;  %v70_v1 = vld [vmem:[#allocation5 + $0x78] sm:$0xff]  ;;  %v69_v2 = vld [vmem:[#allocation5 + $0x70] sm:$0xff] }
  0x1b   :  { %177 = vmatprep.subr.mxu0 %v289_v0  ;;  %209 = vmatprep.mubr.msk.f32.mxu0 %vm290_vm0, %v289_v0  ;;  %v68_v3 = vld [vmem:[#allocation5 + $0x68] sm:$0xff]  ;;  %v67_v4 = vld [vmem:[#allocation5 + $0x60] sm:$0xff]  ;;  %v66_v5 = vld [vmem:[#allocation5 + $0x58] sm:$0xff]  ;;  %s291_s24 = smov [#allocation7]  }
  0x1c   :  { %178 = vmatpush3.msra.mxu0 %v70_v1  ;;  %v65_v6 = vld [vmem:[#allocation5 + $0x50] sm:$0xff]  ;;  %v64_v7 = vld [vmem:[#allocation5 + $0x48] sm:$0xff]  ;;  %v63_v8 = vld [vmem:[#allocation5 + $0x40] sm:$0xff]  ;;  %s149_s25 = sshll.u32 %s291_s24, 4  ;;  %s150_s25 = int_to_ptr.vmem [resolvable:$true] %s149_s25 }
  0x1d   :  { %179 = vmatprep.subr.mxu0 %v289_v0  ;;  %v62_v9 = vld [vmem:[#allocation5 + $0x38] sm:$0xff]  ;;  %v61_v10 = vld [vmem:[#allocation5 + $0x30] sm:$0xff]  ;;  %v60_v11 = vld [vmem:[#allocation5 + $0x28] sm:$0xff]  ;;  %s259_s26 = scalar_lea.vmem %s150_s25, 128  ;;  %p264_p11 = scmp.lt.s32.totalorder %s150_s25, %s150_s25 }
  0x1e   :  { %180 = vmatpush3.msra.mxu0 %v69_v2  ;;  %v59_v12 = vld [vmem:[#allocation5 + $0x20] sm:$0xff]  ;;  %v58_v13 = vld [vmem:[#allocation5 + $0x18] sm:$0xff]  ;;  %v57_v14 = vld [vmem:[#allocation5 + $0x10] sm:$0xff]  ;;  %p260_p10 = scmp.ne.s32.totalorder %s150_s25, %s259_s26  ;;  %p265_p12 = scmp.lt.s32.totalorder %s259_s26, %s259_s26 }
  0x1f   :  { %181 = vmatprep.subr.mxu0 %v289_v0  ;;  %v56_v15 = vld [vmem:[#allocation5 + $0x8] sm:$0xff]  ;;  %v55_v16 = vld [vmem:[#allocation5] sm:$0xff]  ;;  %v54_v17 = vld [vmem:[#allocation2] sm:$0xff] }
  0x20   :  { %182 = vmatpush3.msra.mxu0 %v68_v3  ;;  %v159_v18 = vld [vmem:[%s326_s2] ss:$0 sm:$0xff]  ;;  %p266_p13 = por %p265_p12, %p264_p11 }
  0x21   :  { %183 = vmatprep.subr.mxu0 %v289_v0 }
  0x22   :  { %184 = vmatpush3.msra.mxu0 %v67_v4  ;;  %p267_p0 = pnand %p266_p13, %p260_p10 }
  0x23   :  { %185 = vmatprep.subr.mxu0 %v289_v0 }
  0x24   :  { %186 = vmatpush3.msra.mxu0 %v66_v5 }
  0x25   :  { %187 = vmatprep.subr.mxu0 %v289_v0 }
  0x26   :  { %188 = vmatpush3.msra.mxu0 %v65_v6 }
  0x27   :  { %189 = vmatprep.subr.mxu0 %v289_v0 }
  0x28   :  { %190 = vmatpush3.msra.mxu0 %v64_v7 }
  0x29   :  { %191 = vmatprep.subr.mxu0 %v289_v0 }
  0x2a   :  { %192 = vmatpush3.msra.mxu0 %v63_v8 }
  0x2b   :  { %193 = vmatprep.subr.mxu0 %v289_v0 }
  0x2c   :  { %194 = vmatpush3.msra.mxu0 %v62_v9 }
  0x2d   :  { %195 = vmatprep.subr.mxu0 %v289_v0 }
  0x2e   :  { %196 = vmatpush3.msra.mxu0 %v61_v10 }
  0x2f   :  { %197 = vmatprep.subr.mxu0 %v289_v0 }
  0x30   :  { %198 = vmatpush3.msra.mxu0 %v60_v11 }
  0x31   :  { %199 = vmatprep.subr.mxu0 %v289_v0 }
  0x32   :  { %200 = vmatpush3.msra.mxu0 %v59_v12 }
  0x33   :  { %201 = vmatprep.subr.mxu0 %v289_v0 }
  0x34   :  { %202 = vmatpush3.msra.mxu0 %v58_v13 }
  0x35   :  { %203 = vmatprep.subr.mxu0 %v289_v0 }
  0x36   :  { %204 = vmatpush3.msra.mxu0 %v57_v14 }
  0x37   :  { %205 = vmatprep.subr.mxu0 %v289_v0 }
  0x38   :  { %206 = vmatpush3.msra.mxu0 %v56_v15 }
  0x39   :  { %207 = vmatprep.subr.mxu0 %v289_v0 }
  0x3a   :  { %208 = vmatpush3.msra.mxu0 %v55_v16 }
  0x3b   :  { %210 = vmatmul.mubr.f32.vlgmr.msra.gmra.mxu0 %v54_v17 }
  0xfb   :  { %v137_v19 = vpop.f32.mrf.mxu0 }
  0xfc   :  { %v141_v20 = vadd.f32 %v159_v18, %v137_v19 }
  0xfd   :  { %v211_v21 = vpop.f32.mrf.mxu0 }
  0xfe   :  { %142 = vst [vmem:[#allocation7] sm:$0xff] %v141_v20 }
  0xff   :  { %270 = shalt.err (!%p267_p0)
}
 0x100   :  { %152 = dma.vmem_to_hbm [thread:$0]  %s150_s25, 128, %s327_s3, [#allocation4]  }
 0x101   :  { %283 = dma.done.wait [#allocation4], 128  }
 0x102   :  { %284 = vsyncadd [#allocation4], 4294967168 }
 0x103   :  { %156 = vsyncpa [#allocation3], 1 }
 0x104   :  { %157 = vsyncpa [#allocation6], 1 }
 0x105   :  { %158 = vsyncpa [#allocation4], 1 }

</bundles_post_ra>
